<compile_context>
chip_gen: v5e
topology: v5e:2x2
jax: 0.10.0
libtpu: 0.0.40
codegen_flags: <defaults>
</compile_context>

<pallas_src>
import functools

import jax
import jax.numpy as jnp
from jax import lax
from jax.experimental import pallas as pl
from jax.experimental.pallas import tpu as pltpu

_LANES = 128      # vreg lane width
_SUBLANES = 8     # f32 vreg sublane count


def _round_up(x, m):
    return (x + m - 1) // m * m


def _cdiv(a, b):
    return -(-a // b)


def _pick_nk_tile(dim_padded):
    """Tile width for a lane-padded (multiple-of-128) K or Cout dimension.

    Prefers 512/256-wide tiles so v6e/v7x's 256-wide MXU stays full; falls back
    to 128 only when nothing larger divides (keeps stores lane-dense).
    """
    if dim_padded <= 512:
        return dim_padded
    for cand in (512, 256, 128):
        if dim_padded % cand == 0:
            return cand
    return 128


def _pick_tm(M, block_m, tk, tn, out_bytes, row_align, budget_bytes):
    """Largest row tile that fits the per-step VMEM budget, with >=2 grid steps."""

    def footprint(tm):
        return (2 * tm * tk * 2           # LHS patches (bf16, double-buffered)
                + 2 * tk * tn * 2         # RHS weights (bf16, double-buffered)
                + 2 * tn * 4              # folded bias (f32, double-buffered)
                + 2 * tm * tn * out_bytes # output slab (double-buffered)
                + tm * tn * 4)            # f32 accumulator scratch

    m_ceil = _round_up(max(M, row_align), row_align)
    tm = min(_round_up(block_m, row_align), m_ceil)
    while tm > row_align and footprint(tm) > budget_bytes:
        tm = max(row_align, _round_up(tm // 2, row_align))
    # v7x: make sure there are at least two row tiles so both TensorCores get
    # work under dimension_semantics=("parallel", ...).
    if _cdiv(M, tm) < 2 and M > row_align:
        tm = max(row_align, _round_up(_cdiv(M, 2), row_align))
    # Prefer an even number of row tiles (no tail imbalance across 2 TCs).
    gm = _cdiv(M, tm)
    if gm > 1 and gm % 2 == 1:
        tm_even = max(row_align, _round_up(_cdiv(M, gm + 1), row_align))
        if _cdiv(M, tm_even) % 2 == 0 and footprint(tm_even) <= budget_bytes:
            tm = tm_even
    return tm


def _gemm_bias_act_kernel(p_ref, w_ref, bias_ref, o_ref, acc_ref, *, activation):
    """One (tm, tn) output tile of: relu(patches @ w_scaled + bias).

    p_ref    : (tm, tk) im2col patch rows (bf16)            -- MXU LHS
    w_ref    : (tk, tn) BN-scale-folded HWIO weights (bf16) -- MXU RHS
    bias_ref : (1,  tn) beta + (conv_bias - mean) * scale   (f32)
    o_ref    : (tm, tn) lane-dense output tile (narrow dtype)
    acc_ref  : (tm, tn) f32 accumulator scratch (persists across the K axis)
    """
    @pl.when(pl.program_id(2) == 0)
    def _():
        acc_ref[...] = jnp.zeros_like(acc_ref)

    acc_ref[...] += jnp.dot(p_ref[...], w_ref[...],
                            preferred_element_type=jnp.float32)

    @pl.when(pl.program_id(2) == pl.num_programs(2) - 1)
    def _():
        y = acc_ref[...] + bias_ref[...]       # folded BatchNorm (eval) bias
        if activation:
            y = jnp.maximum(y, 0.0)
        o_ref[...] = y.astype(o_ref.dtype)     # narrow store (bf16 by default)


def conv_block(x_nchw, weight_oihw, conv_bias, gamma, beta,
               running_mean, running_var, *,
               stride=1, activation=True, eps=1e-5,
               block_m=512, compute_dtype=jnp.bfloat16, out_dtype=None,
               vmem_budget_bytes=12 * 1024 * 1024):
    """Pallas equivalent of convBlock.forward (eval-mode BatchNorm), NCHW API.

    Returns an NCHW array in `out_dtype` (defaults to `compute_dtype`, i.e.
    bf16, per the perf review; pass out_dtype=jnp.float32 for a wide output).
    """
    out_dtype = compute_dtype if out_dtype is None else out_dtype
    N, Cin, H, W = x_nchw.shape
    Cout, Cin_w, KH, KW = weight_oihw.shape
    assert Cin == Cin_w
    assert KH == KW, "convBlock uses a square kernel (padding = size // 2)"
    pad = KH // 2
    Ho = (H + 2 * pad - KH) // stride + 1
    Wo = (W + 2 * pad - KW) // stride + 1

    # ---- Layout glue + im2col (plain JAX; XLA fuses the slices). ----------
    x_nhwc = jnp.transpose(x_nchw, (0, 2, 3, 1))
    xp = jnp.pad(x_nhwc, ((0, 0), (pad, pad), (pad, pad), (0, 0)))
    taps = [xp[:, kh:kh + stride * Ho:stride, kw:kw + stride * Wo:stride, :]
            for kh in range(KH) for kw in range(KW)]
    K = KH * KW * Cin
    M = N * Ho * Wo
    patches = jnp.concatenate(taps, axis=-1).reshape(M, K)   # (M, K)

    # ---- Fold BatchNorm (eval) into the GEMM operands. --------------------
    #   scale = gamma / sqrt(var + eps) is folded into the weight COLUMNS, so
    #   the kernel epilogue is only `+ bias; relu`.
    scale = (gamma / jnp.sqrt(running_var + eps)).astype(jnp.float32)
    bias = (beta + (conv_bias - running_mean) * scale).astype(jnp.float32)
    w2d = jnp.transpose(weight_oihw, (2, 3, 1, 0)).reshape(K, Cout)
    w2d = w2d.astype(jnp.float32) * scale[None, :]

    # ---- Lane/sublane-friendly padded GEMM shapes + tile selection. -------
    Kp = _round_up(K, _LANES)
    Np = _round_up(Cout, _LANES)
    tk = _pick_nk_tile(Kp)
    tn = _pick_nk_tile(Np)
    out_bytes = jnp.dtype(out_dtype).itemsize
    row_align = 16 if jnp.dtype(compute_dtype).itemsize == 2 else _SUBLANES
    tm = _pick_tm(M, block_m, tk, tn, out_bytes, row_align, vmem_budget_bytes)
    grid_m = _cdiv(M, tm)
    Mp = grid_m * tm
    grid = (grid_m, Np // tn, Kp // tk)

    patches_p = jnp.zeros((Mp, Kp), compute_dtype).at[:M, :K].set(
        patches.astype(compute_dtype))
    w_p = jnp.zeros((Kp, Np), compute_dtype).at[:K, :Cout].set(
        w2d.astype(compute_dtype))
    bias_p = jnp.zeros((1, Np), jnp.float32).at[0, :Cout].set(bias)

    kernel = functools.partial(_gemm_bias_act_kernel, activation=activation)

    out2d = pl.pallas_call(
        kernel,
        out_shape=jax.ShapeDtypeStruct((Mp, Np), out_dtype),
        grid_spec=pltpu.PrefetchScalarGridSpec(
            num_scalar_prefetch=0,
            grid=grid,
            in_specs=[
                pl.BlockSpec((tm, tk), lambda i, j, k: (i, k)),  # patch rows
                pl.BlockSpec((tk, tn), lambda i, j, k: (k, j)),  # scaled weights
                pl.BlockSpec((1, tn), lambda i, j, k: (0, j)),   # folded BN bias
            ],
            out_specs=pl.BlockSpec((tm, tn), lambda i, j, k: (i, j)),
            scratch_shapes=[pltpu.VMEM((tm, tn), jnp.float32)],
        ),
        compiler_params=pltpu.CompilerParams(
            # Independent (row, Cout) tiles shard across v7x's 2 TCs; the K
            # axis carries the accumulator -> "arbitrary".
            dimension_semantics=("parallel", "parallel", "arbitrary"),
            # Explicit scoped-VMEM limit: per-step footprint is capped at
            # ~12 MiB by _pick_tm, so 32 MiB is safe headroom on all of
            # v5e (128 MiB phys), v6e (128 MiB) and v7x (64 MiB).
            vmem_limit_bytes=32 * 1024 * 1024,
        ),
    )(patches_p, w_p, bias_p)

    # Strip padding only when it exists (skips an HBM copy for aligned shapes).
    if (Mp, Np) != (M, Cout):
        out2d = out2d[:M, :Cout]
    out = out2d.reshape(N, Ho, Wo, Cout)
    return jnp.transpose(out, (0, 3, 1, 2))          # back to NCHW


def _reference(x, w_oihw, conv_bias, gamma, beta, rm, rv, *,
               stride, activation, eps=1e-5,
               compute_dtype=jnp.bfloat16, out_dtype=jnp.bfloat16):
    """Pure-JAX reference (eval-mode BN), NCHW, with the kernel's intended
    bf16 quantization applied to the folded operands so the check isolates
    kernel correctness from MXU-dtype rounding."""
    scale = gamma / jnp.sqrt(rv + eps)
    w_fold = w_oihw * scale[:, None, None, None]
    bias = beta + (conv_bias - rm) * scale
    xq = x.astype(compute_dtype).astype(jnp.float32)
    wq = w_fold.astype(compute_dtype).astype(jnp.float32)
    pad = w_oihw.shape[2] // 2
    dn = lax.conv_dimension_numbers(x.shape, w_oihw.shape,
                                    ('NCHW', 'OIHW', 'NCHW'))
    y = lax.conv_general_dilated(
        xq, wq, (stride, stride), [(pad, pad), (pad, pad)],
        dimension_numbers=dn)
    y = y + bias[None, :, None, None]
    if activation:
        y = jnp.maximum(y, 0.0)
    return y.astype(out_dtype)


if __name__ == "__main__":
    # Module config: convBlock(in_channels=4, filters=8, size=3, stride=1)
    N, Cin, H, W = 2, 4, 16, 16
    Cout, Ksz, stride = 8, 3, 1
    activation = True

    key = jax.random.PRNGKey(0)
    kx, kw, kb, kg, kbe, krm, krv = jax.random.split(key, 7)

    x = jax.random.normal(kx, (N, Cin, H, W), jnp.float32)
    weight = jax.random.normal(kw, (Cout, Cin, Ksz, Ksz), jnp.float32) * 0.1
    conv_bias = jax.random.normal(kb, (Cout,), jnp.float32) * 0.1
    gamma = 1.0 + 0.1 * jax.random.normal(kg, (Cout,), jnp.float32)
    beta = 0.1 * jax.random.normal(kbe, (Cout,), jnp.float32)
    running_mean = 0.1 * jax.random.normal(krm, (Cout,), jnp.float32)
    running_var = jax.random.uniform(krv, (Cout,), jnp.float32,
                                     minval=0.5, maxval=1.5)

    out = conv_block(x, weight, conv_bias, gamma, beta,
                     running_mean, running_var,
                     stride=stride, activation=activation)
    out = jax.block_until_ready(out)

    ref = _reference(x, weight, conv_bias, gamma, beta,
                     running_mean, running_var,
                     stride=stride, activation=activation)

    assert out.shape == (N, Cout, H, W)
    # Both sides use bf16-quantized folded operands and a bf16 store; the only
    # remaining differences are f32 accumulation order and 1-ulp bf16 rounding.
    assert jnp.allclose(out.astype(jnp.float32), ref.astype(jnp.float32),
                        atol=1e-2, rtol=1e-2), "mismatch vs reference"

    print("KERNEL_OK")
</pallas_src>

<mosaic_0001>
module attributes {stable_mosaic.version = 11 : i64} {
  func.func @_gemm_bias_act_kernel(%arg0: i32, %arg1: i32, %arg2: i32, %arg3: memref<256x128xbf16, #tpu.memory_space<vmem>>, %arg4: memref<128x128xbf16, #tpu.memory_space<vmem>>, %arg5: memref<1x128xf32, #tpu.memory_space<vmem>>, %arg6: memref<256x128xbf16, #tpu.memory_space<vmem>>, %arg7: memref<256x128xf32, #tpu.memory_space<vmem>>) attributes {dimension_semantics = [#tpu.dimension_semantics<parallel>, #tpu.dimension_semantics<parallel>, #tpu.dimension_semantics<arbitrary>], iteration_bounds = array<i64: 2, 1, 1>, scalar_prefetch = 0 : i64, scratch_operands = 1 : i64, tpu.core_type = #tpu.core_type<tc>, window_params = [{transform_indices = @transform_0, window_bounds = array<i64: 256, 128>}, {transform_indices = @transform_1, window_bounds = array<i64: 128, 128>}, {transform_indices = @transform_2, window_bounds = array<i64: 1, 128>}, {transform_indices = @transform_3, window_bounds = array<i64: 256, 128>}]} {
    %c0_i32 = arith.constant 0 : i32
    %0 = arith.cmpi eq, %arg2, %c0_i32 : i32
    %1 = arith.extui %0 : i1 to i32
    %c0_i32_0 = arith.constant 0 : i32
    %2 = arith.cmpi ne, %1, %c0_i32_0 : i32
    scf.if %2 {
      %cst_10 = arith.constant 0.000000e+00 : f32
      %12 = vector.broadcast %cst_10 : f32 to vector<256x128xf32>
      %c0_11 = arith.constant 0 : index
      %c0_12 = arith.constant 0 : index
      %13 = vector.load %arg7[%c0_11, %c0_12] : memref<256x128xf32, #tpu.memory_space<vmem>>, vector<256x128xf32>
      tpu.vector_store %arg7[%c0_11, %c0_12], %12 {strides = array<i32>} : memref<256x128xf32, #tpu.memory_space<vmem>>, vector<256x128xf32>,
    } else {
    }
    %c0 = arith.constant 0 : index
    %c0_1 = arith.constant 0 : index
    %3 = vector.load %arg7[%c0, %c0_1] : memref<256x128xf32, #tpu.memory_space<vmem>>, vector<256x128xf32>
    %c0_2 = arith.constant 0 : index
    %c0_3 = arith.constant 0 : index
    %4 = vector.load %arg3[%c0_2, %c0_3] : memref<256x128xbf16, #tpu.memory_space<vmem>>, vector<256x128xbf16>
    %c0_4 = arith.constant 0 : index
    %c0_5 = arith.constant 0 : index
    %5 = vector.load %arg4[%c0_4, %c0_5] : memref<128x128xbf16, #tpu.memory_space<vmem>>, vector<128x128xbf16>
    %cst = arith.constant dense<0.000000e+00> : vector<256x128xf32>
    %6 = tpu.matmul %4, %5, %cst {dimension_numbers = #tpu.dot_dimension_numbers<[1], [0], [0], [1], [0, 0, 1, 1], [], []>} : vector<256x128xbf16>, vector<128x128xbf16>, vector<256x128xf32> -> vector<256x128xf32>
    %7 = arith.addf %3, %6 : vector<256x128xf32>
    %c0_6 = arith.constant 0 : index
    %c0_7 = arith.constant 0 : index
    %8 = vector.load %arg7[%c0_6, %c0_7] : memref<256x128xf32, #tpu.memory_space<vmem>>, vector<256x128xf32>
    tpu.vector_store %arg7[%c0_6, %c0_7], %7 {strides = array<i32>} : memref<256x128xf32, #tpu.memory_space<vmem>>, vector<256x128xf32>,
    %c0_i32_8 = arith.constant 0 : i32
    %9 = arith.cmpi eq, %arg2, %c0_i32_8 : i32
    %10 = arith.extui %9 : i1 to i32
    %c0_i32_9 = arith.constant 0 : i32
    %11 = arith.cmpi ne, %10, %c0_i32_9 : i32
    scf.if %11 {
      %c0_10 = arith.constant 0 : index
      %c0_11 = arith.constant 0 : index
      %12 = vector.load %arg7[%c0_10, %c0_11] : memref<256x128xf32, #tpu.memory_space<vmem>>, vector<256x128xf32>
      %c0_12 = arith.constant 0 : index
      %c0_13 = arith.constant 0 : index
      %13 = vector.load %arg5[%c0_12, %c0_13] : memref<1x128xf32, #tpu.memory_space<vmem>>, vector<1x128xf32>
      %14 = vector.broadcast %13 : vector<1x128xf32> to vector<256x128xf32>
      %15 = arith.addf %12, %14 : vector<256x128xf32>
      %cst_14 = arith.constant 0.000000e+00 : f32
      %16 = vector.broadcast %cst_14 : f32 to vector<256x128xf32>
      %17 = arith.maximumf %15, %16 : vector<256x128xf32>
      %18 = arith.truncf %17 : vector<256x128xf32> to vector<256x128xbf16>
      %c0_15 = arith.constant 0 : index
      %c0_16 = arith.constant 0 : index
      %19 = vector.load %arg6[%c0_15, %c0_16] : memref<256x128xbf16, #tpu.memory_space<vmem>>, vector<256x128xbf16>
      tpu.vector_store %arg6[%c0_15, %c0_16], %18 {strides = array<i32>} : memref<256x128xbf16, #tpu.memory_space<vmem>>, vector<256x128xbf16>,
    } else {
    }
    return
  }
  func.func @transform_0(%arg0: i32, %arg1: i32, %arg2: i32) -> (i32, i32) {
    %c0_i32 = arith.constant 0 : i32
    return %arg0, %arg2 : i32, i32
  }
  func.func @transform_1(%arg0: i32, %arg1: i32, %arg2: i32) -> (i32, i32) {
    %c0_i32 = arith.constant 0 : i32
    return %arg2, %arg1 : i32, i32
  }
  func.func @transform_2(%arg0: i32, %arg1: i32, %arg2: i32) -> (i32, i32) {
    %c0_i32 = arith.constant 0 : i32
    %c0_i32_0 = arith.constant 0 : i32
    return %c0_i32, %arg1 : i32, i32
  }
  func.func @transform_3(%arg0: i32, %arg1: i32, %arg2: i32) -> (i32, i32) {
    %c0_i32 = arith.constant 0 : i32
    return %arg0, %arg1 : i32, i32
  }
}

</mosaic_0001>

<bundles_post_ra>
// kernel: tpu_custom_call.1
= control target key start
LH: loop header
LB: loop body
LE: loop exit
PB: predicated region body
PF: predicated region fallthrough
CT: control target
= control target key end

     0   :  { %s1714_s0 = inlined_call_operand.hbm [shape: bf16[512,128], index: 0, kind: input, shape index: {}]   ;;  %s1715_s1 = inlined_call_operand.hbm [shape: bf16[128,128], index: 1, kind: input, shape index: {}]   ;;  %s1716_s2 = inlined_call_operand.vmem [shape: f32[1,128], index: 2, kind: input, shape index: {}]   ;;  %s1717_s3 = inlined_call_operand.hbm [shape: bf16[512,128], index: 3, kind: output, shape index: {}]  }
   0x1   :  { %1719 = sst [smem:[#allocation12_spill]] %s1715_s1 }
   0x2   :  { %8 = vsyncpa [#allocation4], 0 }
   0x3   :  { %10 = vsyncpa [#allocation4 + $0x1], 0 }
   0x4   :  { %11 = vsyncpa [#allocation7], 0 }
   0x5   :  { %12 = vsyncpa [#allocation5], 0 }
   0x6   :  { %14 = vsyncpa [#allocation5 + $0x1], 0  ;;  %s1481_s12 = smov 0   ;;  %s1483_s13 = smov 0  }
   0x7   :  { %s1485_s14 = smov 0   ;;  %s1487_s15 = smov 0  }
   0x8   :  { %s1489_s16 = smov 0   ;;  %s1491_s17 = smov 0  }
   0x9 LB: > { %s971_s18 = sadd.s32 4294967295, %s1454_s17   ;;  %s972_s19 = sadd.s32 4294967294, %s1454_s17   ;;  %s1454_s17 = sphi %s1491_s17, %s20_s17   ;;  %s1450_s16 = sphi %s1489_s16, %s1733_s16   ;;  %s1446_s15 = sphi %s1487_s15, %s1732_s15   ;;  %s1442_s14 = sphi %s1485_s14, %s1731_s14   ;;  %s1438_s13 = sphi %s1483_s13, %s1730_s13   ;;  %s1434_s12 = sphi %s1481_s12, %s1729_s12  }
   0xa   : > { %p61_p0 = scmp.ne.s32.totalorder %s1438_s13, %s1434_s12  ;;  %p1515_p1 = scmp.eq.s32.totalorder %s971_s18, 0 }
   0xb   : > { %p1519_p2 = scmp.eq.s32.totalorder %s971_s18, 1  ;;  %p147_p3 = scmp.eq.s32.totalorder %s972_s19, 1 }
   0xc   : > { %p1525_p4 = por %p1515_p1, %p61_p0  ;;  %p973_p5 = scmp.ge.s32.totalorder %s1454_s17, 1 }
   0xd   : > { %p1530_p6 = por %p147_p3, %p61_p0  ;;  %p154_p7 = scmp.lt.s32.totalorder %s1454_s17, 3 }
   0xe   : > { %s1724_s1 = sld [smem:[#allocation12_spill]]  ;;  %s1456_s28 = smov [#allocation6]  }
   0xf   : > { %p1538_p8 = pnand %p973_p5, %p154_p7  ;;  %s171_s29 = sshll.u32 %s1456_s28, 4  ;;  %s172_s29 = int_to_ptr.vmem [resolvable:$true] %s171_s29 }
  0x10   : > { %p976_p11 = scmp.ge.s32.totalorder %s1454_s17, 2  ;;  %s1718_s30 = smov 64  }
  0x11   : > { %p1238_p9 = pneg %p1538_p8  ;;  %s1458_s4 = smov 4  }
  0x12   : > { %s39_s5 = sadd.s32 1, %s1450_s16  ;;  %s48_s6 = sadd.s32 1, %s1442_s14 }
  0x13   : > { %p1239_p10 = pnand %p1238_p9, %p1515_p1  ;;  %p41_p12 = scmp.ge.s32.totalorder %s39_s5, 2 }
  0x14   : > { %s169_s26 = sshll.u32 %s1724_s1, 4  ;;  %p55_p13 = scmp.ne.s32.totalorder %s1442_s14, %s1438_s13  ;;  %s170_s26 = int_to_ptr.hbm [resolvable:$true] %s169_s26 }
  0x15   : > { %1241 = dma.hbm_to_vmem [thread:$0]  (!%p1239_p10), %s170_s26, 1024, %s172_s29, [#allocation7], %s1718_s30, %s1718_s30, %s1458_s4  }
  0x16   : > { %p56_p0 = scmp.eq.s32.totalorder %s1454_s17, 0  ;;  %s1735_s5 = smov (%p41_p12, %s39_s5), 0 }
  0x17   : > { %p1563_p5 = por %p1519_p2, %p55_p13  ;;  %s43_s9 = ssub.s32 %s1450_s16, %s1735_s5 }
  0x18   : > { %p1557_p3 = por %p56_p0, %p55_p13  ;;  %p1251_p7 = scmp.lt.s32.totalorder %s1454_s17, 2 }
  0x19   : > { %p46_p9 = scmp.eq.s32.totalorder %s43_s9, 0  ;;  %s191_s10 = sand.u32 1, %s1442_s14  }
  0x1a   : > { %s977_s11 = sshll.u32 %s191_s10, 7  ;;  %s1085_s19 = sshll.u32 %s1450_s16, 7 }
  0x1b   : > { %s1572_s18 = scalar_select %p46_p9, %s1442_s14, %s48_s6  }
  0x1c   : > { %s201_s26 = scalar_lea.hbm %s1714_s0, %s1085_s19  ;;  %s195_s28 = scalar_lea.vmem [#allocation3], %s977_s11 }
  0x1d   : > { %s204_s29 = sshll.u32 %s195_s28, 4  ;;  %s202_s21 = sshll.u32 %s201_s26, 4  ;;  %s205_s29 = int_to_ptr.vmem [resolvable:$true] %s204_s29  ;;  %s203_s21 = int_to_ptr.hbm [resolvable:$true] %s202_s21 }
  0x1e   : > { %p1243_p2 = pnand %p1251_p7, %p1557_p3  ;;  %s192_s30 = scalar_lea.sflag [#allocation4], %s191_s10 }
  0x1f   : > { %s1728_s1 = smov 64   ;;  %216 = sbr.rel (%p1538_p8) target bundleno = 271 (0x10f), region = 32 }
  0x20   : > { %1245 = dma.hbm_to_vmem [thread:$0]  (!%p1243_p2), %s203_s21, 2048, %s205_s29, %s192_s30, %s1728_s1, %s1728_s1, %s1458_s4  }
  0x21   : > { %s1586_s6 = sand.u32 (!%p1538_p8), 1, %s1438_s13  }
  0x22   : > { %s981_s9 = sshll.u32 (!%p1538_p8), %s1586_s6, 7  ;;  %s219_s11 = scalar_lea.sflag (!%p1538_p8), [#allocation4], %s1586_s6 }
  0x23   : > { %s1592_s7 = scalar_lea.vmem (!%p1538_p8), [#allocation3], %s981_s9 }
  0x24   : > { %1421 = dma.done.wait (%p1525_p4), %s219_s11, 2048  }
  0x25   : > { %1423 = vsyncadd (%p1525_p4), %s219_s11, 4294965248 }
  0x26   : > { %1425 = dma.done.wait (%p1515_p1), [#allocation7], 1024  }
  0x27   : > { %1427 = vsyncadd (%p1515_p1), [#allocation7], 4294966272  ;;  %v1109_v0 = vld [vmem:[#allocation6 + $0x38] sm:$0xff]  ;;  %v1108_v1 = vld [vmem:[#allocation6 + $0x30] sm:$0xff]  ;;  %s1631_s22 = scalar_lea.vmem [#allocation8], %s981_s9  ;;  %s1110_s27 = sshll.u32 %s1446_s15, 7 }
  0x28   : > { %520 = vmatpush.bf16.msra.mxu0 %v1109_v0  ;;  %1206 = vmatpush.bf16.msra.mxu1 %v1109_v0  ;;  %v1107_v2 = vld [vmem:[#allocation6 + $0x28] sm:$0xff]  ;;  %v1106_v3 = vld [vmem:[#allocation6 + $0x20] sm:$0xff]  ;;  %v1105_v4 = vld [vmem:[#allocation6 + $0x18] sm:$0xff]  ;;  %s853_s10 = scalar_lea.hbm %s1717_s3, %s1110_s27  ;;  %s854_s15 = sshll.u32 %s1631_s22, 4  ;;  %s855_s15 = int_to_ptr.vmem [resolvable:$true] %s854_s15 }
  0x29   : > { %1207 = vmatpush.bf16.msra.mxu2 %v1109_v0  ;;  %1208 = vmatpush.bf16.msra.mxu3 %v1109_v0  ;;  %v1104_v5 = vld [vmem:[#allocation6 + $0x10] sm:$0xff]  ;;  %v1103_v6 = vld [vmem:[#allocation6 + $0x8] sm:$0xff]  ;;  %v1102_v7 = vld [vmem:[#allocation6] sm:$0xff]  ;;  %s856_s19 = sshll.u32 %s853_s10, 4  ;;  %s841_s24 = scalar_lea.sflag [#allocation5], %s1586_s6  ;;  %s857_s19 = int_to_ptr.hbm [resolvable:$true] %s856_s19 }
  0x2a   : > { %v1086_v8 = vld [vmem:[%s1592_s7] sm:$0xff]  ;;  %v1087_v12 = vld [vmem:[%s1592_s7 + $0x8] sm:$0xff]  ;;  %v1088_v16 = vld [vmem:[%s1592_s7 + $0x10] sm:$0xff]  ;;  %s1382_s25 = sshra.s32 %s857_s19, 4  ;;  %s1388_s21 = scalar_lea.hbm %s1717_s3, 256  ;;  %s1383_s25 = int_to_ptr.hbm [resolvable:$true] %s1382_s25 }
  0x2b   : > { %v1090_v9 = vld [vmem:[%s1592_s7 + $0x20] sm:$0xff]  ;;  %v1091_v13 = vld [vmem:[%s1592_s7 + $0x28] sm:$0xff]  ;;  %v1092_v17 = vld [vmem:[%s1592_s7 + $0x30] sm:$0xff]  ;;  %s1384_s26 = scalar_lea.hbm %s1383_s25, 128  ;;  %p1389_p10 = scmp.lt.s32.totalorder %s1383_s25, %s1717_s3 }
  0x2c   : > { %521 = vmatpush.bf16.msra.mxu0 %v1108_v1  ;;  %1209 = vmatpush.bf16.msra.mxu1 %v1108_v1  ;;  %v1094_v10 = vld [vmem:[%s1592_s7 + $0x40] sm:$0xff]  ;;  %v1095_v14 = vld [vmem:[%s1592_s7 + $0x48] sm:$0xff]  ;;  %v1096_v18 = vld [vmem:[%s1592_s7 + $0x50] sm:$0xff]  ;;  %p1385_p1 = scmp.ne.s32.totalorder %s1383_s25, %s1384_s26  ;;  %p1390_p12 = scmp.lt.s32.totalorder %s1388_s21, %s1384_s26 }
  0x2d   : > { %1210 = vmatpush.bf16.msra.mxu2 %v1108_v1  ;;  %1211 = vmatpush.bf16.msra.mxu3 %v1108_v1  ;;  %v1098_v11 = vld [vmem:[%s1592_s7 + $0x60] sm:$0xff]  ;;  %v1099_v15 = vld [vmem:[%s1592_s7 + $0x68] sm:$0xff]  ;;  %v1100_v19 = vld [vmem:[%s1592_s7 + $0x70] sm:$0xff] }
  0x2e   : > { %v1089_v20 = vld [vmem:[%s1592_s7 + $0x18] sm:$0xff]  ;;  %v1621_v26 = vld [vmem:[%s1716_s2] ss:$0 sm:$0xff]  ;;  %p1386_p4 = pnand %p1385_p1, %p1563_p5  ;;  %p1391_p13 = por %p1390_p12, %p1389_p10 }
  0x2f   : > { %v1093_v21 = vld [vmem:[%s1592_s7 + $0x38] sm:$0xff] }
  0x30   : > { %522 = vmatpush.bf16.msra.mxu0 %v1107_v2  ;;  %1212 = vmatpush.bf16.msra.mxu1 %v1107_v2  ;;  %v1097_v22 = vld [vmem:[%s1592_s7 + $0x58] sm:$0xff]  ;;  %p1387_p8 = pneg %p1386_p4 }
  0x31   : > { %1213 = vmatpush.bf16.msra.mxu2 %v1107_v2  ;;  %1214 = vmatpush.bf16.msra.mxu3 %v1107_v2  ;;  %v1101_v23 = vld [vmem:[%s1592_s7 + $0x78] sm:$0xff] }
  0x32   : > { %p1392_p0 = pnand %p1391_p13, %p1387_p8 }
  0x34   : > { %523 = vmatpush.bf16.msra.mxu0 %v1106_v3  ;;  %1215 = vmatpush.bf16.msra.mxu1 %v1106_v3 }
  0x35   : > { %1216 = vmatpush.bf16.msra.mxu2 %v1106_v3  ;;  %1217 = vmatpush.bf16.msra.mxu3 %v1106_v3 }
  0x38   : > { %524 = vmatpush.bf16.msra.mxu0 %v1105_v4  ;;  %1218 = vmatpush.bf16.msra.mxu1 %v1105_v4 }
  0x39   : > { %1219 = vmatpush.bf16.msra.mxu2 %v1105_v4  ;;  %1220 = vmatpush.bf16.msra.mxu3 %v1105_v4 }
  0x3c   : > { %525 = vmatpush.bf16.msra.mxu0 %v1104_v5  ;;  %1221 = vmatpush.bf16.msra.mxu1 %v1104_v5 }
  0x3d   : > { %1222 = vmatpush.bf16.msra.mxu2 %v1104_v5  ;;  %1223 = vmatpush.bf16.msra.mxu3 %v1104_v5 }
  0x40   : > { %526 = vmatpush.bf16.msra.mxu0 %v1103_v6  ;;  %1224 = vmatpush.bf16.msra.mxu1 %v1103_v6 }
  0x41   : > { %1225 = vmatpush.bf16.msra.mxu2 %v1103_v6  ;;  %1226 = vmatpush.bf16.msra.mxu3 %v1103_v6 }
  0x44   : > { %527 = vmatpush.bf16.msra.mxu0 %v1102_v7  ;;  %1227 = vmatpush.bf16.msra.mxu1 %v1102_v7 }
  0x45   : > { %1228 = vmatpush.bf16.msra.mxu2 %v1102_v7  ;;  %1229 = vmatpush.bf16.msra.mxu3 %v1102_v7 }
  0x47   : > { %528 = vmatmul.bf16.vlgmr.msra.gmra.mxu0 %v1086_v8  ;;  %548 = vmatmul.bf16.vlgmr.msra.gmra.mxu1 %v1090_v9 }
  0x48   : > { %568 = vmatmul.bf16.vlgmr.msra.gmra.mxu2 %v1094_v10  ;;  %588 = vmatmul.bf16.vlgmr.msra.gmra.mxu3 %v1098_v11 }
  0x57   : > { %533 = vmatmul.bf16.gmra.mxu0 %v1087_v12  ;;  %553 = vmatmul.bf16.gmra.mxu1 %v1091_v13 }
  0x58   : > { %573 = vmatmul.bf16.gmra.mxu2 %v1095_v14  ;;  %593 = vmatmul.bf16.gmra.mxu3 %v1099_v15 }
  0x67   : > { %538 = vmatmul.bf16.gmra.mxu0 %v1088_v16  ;;  %558 = vmatmul.bf16.gmra.mxu1 %v1092_v17 }
  0x68   : > { %578 = vmatmul.bf16.gmra.mxu2 %v1096_v18  ;;  %598 = vmatmul.bf16.gmra.mxu3 %v1100_v19 }
  0x77   : > { %543 = vmatmul.bf16.gmra.mxu0 %v1089_v20  ;;  %563 = vmatmul.bf16.gmra.mxu1 %v1093_v21 }
  0x78   : > { %583 = vmatmul.bf16.gmra.mxu2 %v1097_v22  ;;  %603 = vmatmul.bf16.gmra.mxu3 %v1101_v23 }
  0xc4   : > { %v529_v24 = vpop.f32.mrf.mxu0  ;;  %v549_v25 = vpop.f32.mrf.mxu1 }
  0xc5   : > { %v712_v27 = vadd.f32 %v1621_v26, %v529_v24  ;;  %v720_v28 = vadd.f32 %v1621_v26, %v549_v25 }
  0xc7   : > { %v744_v35 = vmax.f32 %v712_v27, 0.0  ;;  %v752_v36 = vmax.f32 %v720_v28, 0.0 }
  0xcb   : > { %v569_v29 = vpop.f32.mrf.mxu2  ;;  %v589_v30 = vpop.f32.mrf.mxu3 }
  0xcc   : > { %v531_v31 = vpop.f32.mrf.mxu0  ;;  %v551_v32 = vpop.f32.mrf.mxu1  ;;  %v728_v41 = vadd.f32 %v1621_v26, %v569_v29  ;;  %v736_v42 = vadd.f32 %v1621_v26, %v589_v30 }
  0xcd   : > { %v713_v33 = vadd.f32 %v1621_v26, %v531_v31  ;;  %v721_v34 = vadd.f32 %v1621_v26, %v551_v32 }
  0xce   : > { %v760_v49 = vmax.f32 %v728_v41, 0.0  ;;  %v768_v50 = vmax.f32 %v736_v42, 0.0 }
  0xcf   : > { %v745_v37 = vmax.f32 %v713_v33, 0.0  ;;  %v753_v38 = vmax.f32 %v721_v34, 0.0 }
  0xd1   : > { %v1114_v39 = vpack.c.bf16 %v745_v37, %v744_v35  ;;  %v1134_v40 = vpack.c.bf16 %v753_v38, %v752_v36 }
  0xd3   : > { %1115 = vst [vmem:[%s1631_s22] sm:$0xff] %v1114_v39   ;;  %v571_v43 = vpop.f32.mrf.mxu2  ;;  %v591_v44 = vpop.f32.mrf.mxu3 }
  0xd4   : > { %1194 = vst [vmem:[%s1631_s22 + $0x20] sm:$0xff] %v1134_v40   ;;  %v729_v45 = vadd.f32 %v1621_v26, %v571_v43  ;;  %v737_v46 = vadd.f32 %v1621_v26, %v591_v44  ;;  %v534_v47 = vpop.f32.mrf.mxu0  ;;  %v554_v48 = vpop.f32.mrf.mxu1 }
  0xd5   : > { %v714_v55 = vadd.f32 %v1621_v26, %v534_v47  ;;  %v722_v56 = vadd.f32 %v1621_v26, %v554_v48 }
  0xd6   : > { %v761_v51 = vmax.f32 %v729_v45, 0.0  ;;  %v769_v52 = vmax.f32 %v737_v46, 0.0 }
  0xd7   : > { %v746_v63 = vmax.f32 %v714_v55, 0.0  ;;  %v754_v0 = vmax.f32 %v722_v56, 0.0 }
  0xd8   : > { %v1154_v53 = vpack.c.bf16 %v761_v51, %v760_v49  ;;  %v1174_v54 = vpack.c.bf16 %v769_v52, %v768_v50 }
  0xda   : > { %1198 = vst [vmem:[%s1631_s22 + $0x40] sm:$0xff] %v1154_v53  }
  0xdb   : > { %1202 = vst [vmem:[%s1631_s22 + $0x60] sm:$0xff] %v1174_v54   ;;  %v574_v57 = vpop.f32.mrf.mxu2  ;;  %v594_v58 = vpop.f32.mrf.mxu3 }
  0xdc   : > { %v536_v59 = vpop.f32.mrf.mxu0  ;;  %v556_v60 = vpop.f32.mrf.mxu1  ;;  %v730_v5 = vadd.f32 %v1621_v26, %v574_v57  ;;  %v738_v6 = vadd.f32 %v1621_v26, %v594_v58 }
  0xdd   : > { %v715_v61 = vadd.f32 %v1621_v26, %v536_v59  ;;  %v723_v62 = vadd.f32 %v1621_v26, %v556_v60 }
  0xde   : > { %v762_v13 = vmax.f32 %v730_v5, 0.0  ;;  %v770_v14 = vmax.f32 %v738_v6, 0.0 }
  0xdf   : > { %v747_v1 = vmax.f32 %v715_v61, 0.0  ;;  %v755_v2 = vmax.f32 %v723_v62, 0.0 }
  0xe1   : > { %v1119_v3 = vpack.c.bf16 %v747_v1, %v746_v63  ;;  %v1139_v4 = vpack.c.bf16 %v755_v2, %v754_v0 }
  0xe3   : > { %1191 = vst [vmem:[%s1631_s22 + $0x8] sm:$0xff] %v1119_v3   ;;  %v576_v7 = vpop.f32.mrf.mxu2  ;;  %v596_v8 = vpop.f32.mrf.mxu3 }
  0xe4   : > { %1195 = vst [vmem:[%s1631_s22 + $0x28] sm:$0xff] %v1139_v4   ;;  %v731_v9 = vadd.f32 %v1621_v26, %v576_v7  ;;  %v739_v10 = vadd.f32 %v1621_v26, %v596_v8  ;;  %v539_v11 = vpop.f32.mrf.mxu0  ;;  %v559_v12 = vpop.f32.mrf.mxu1 }
  0xe5   : > { %v716_v19 = vadd.f32 %v1621_v26, %v539_v11  ;;  %v724_v20 = vadd.f32 %v1621_v26, %v559_v12 }
  0xe6   : > { %v763_v15 = vmax.f32 %v731_v9, 0.0  ;;  %v771_v16 = vmax.f32 %v739_v10, 0.0 }
  0xe7   : > { %v748_v28 = vmax.f32 %v716_v19, 0.0  ;;  %v756_v29 = vmax.f32 %v724_v20, 0.0 }
  0xe8   : > { %v1159_v17 = vpack.c.bf16 %v763_v15, %v762_v13  ;;  %v1179_v18 = vpack.c.bf16 %v771_v16, %v770_v14 }
  0xea   : > { %1199 = vst [vmem:[%s1631_s22 + $0x48] sm:$0xff] %v1159_v17  }
  0xeb   : > { %1203 = vst [vmem:[%s1631_s22 + $0x68] sm:$0xff] %v1179_v18   ;;  %v579_v21 = vpop.f32.mrf.mxu2  ;;  %v599_v22 = vpop.f32.mrf.mxu3 }
  0xec   : > { %v541_v23 = vpop.f32.mrf.mxu0  ;;  %v561_v24 = vpop.f32.mrf.mxu1  ;;  %v732_v34 = vadd.f32 %v1621_v26, %v579_v21  ;;  %v740_v35 = vadd.f32 %v1621_v26, %v599_v22 }
  0xed   : > { %v717_v25 = vadd.f32 %v1621_v26, %v541_v23  ;;  %v725_v27 = vadd.f32 %v1621_v26, %v561_v24 }
  0xee   : > { %v764_v42 = vmax.f32 %v732_v34, 0.0  ;;  %v772_v43 = vmax.f32 %v740_v35, 0.0 }
  0xef   : > { %v749_v30 = vmax.f32 %v717_v25, 0.0  ;;  %v757_v31 = vmax.f32 %v725_v27, 0.0 }
  0xf1   : > { %v1124_v32 = vpack.c.bf16 %v749_v30, %v748_v28  ;;  %v1144_v33 = vpack.c.bf16 %v757_v31, %v756_v29 }
  0xf3   : > { %1192 = vst [vmem:[%s1631_s22 + $0x10] sm:$0xff] %v1124_v32   ;;  %v581_v36 = vpop.f32.mrf.mxu2  ;;  %v601_v37 = vpop.f32.mrf.mxu3 }
  0xf4   : > { %1196 = vst [vmem:[%s1631_s22 + $0x30] sm:$0xff] %v1144_v33   ;;  %v733_v38 = vadd.f32 %v1621_v26, %v581_v36  ;;  %v741_v39 = vadd.f32 %v1621_v26, %v601_v37  ;;  %v544_v40 = vpop.f32.mrf.mxu0  ;;  %v564_v41 = vpop.f32.mrf.mxu1 }
  0xf5   : > { %v718_v48 = vadd.f32 %v1621_v26, %v544_v40  ;;  %v726_v49 = vadd.f32 %v1621_v26, %v564_v41 }
  0xf6   : > { %v765_v44 = vmax.f32 %v733_v38, 0.0  ;;  %v773_v45 = vmax.f32 %v741_v39, 0.0 }
  0xf7   : > { %v750_v56 = vmax.f32 %v718_v48, 0.0  ;;  %v758_v57 = vmax.f32 %v726_v49, 0.0 }
  0xf8   : > { %v1164_v46 = vpack.c.bf16 %v765_v44, %v764_v42  ;;  %v1184_v47 = vpack.c.bf16 %v773_v45, %v772_v43 }
  0xfa   : > { %1200 = vst [vmem:[%s1631_s22 + $0x50] sm:$0xff] %v1164_v46  }
  0xfb   : > { %1204 = vst [vmem:[%s1631_s22 + $0x70] sm:$0xff] %v1184_v47   ;;  %v584_v50 = vpop.f32.mrf.mxu2  ;;  %v604_v51 = vpop.f32.mrf.mxu3 }
  0xfc   : > { %v546_v52 = vpop.f32.mrf.mxu0  ;;  %v566_v53 = vpop.f32.mrf.mxu1  ;;  %v734_v62 = vadd.f32 %v1621_v26, %v584_v50  ;;  %v742_v63 = vadd.f32 %v1621_v26, %v604_v51 }
  0xfd   : > { %v719_v54 = vadd.f32 %v1621_v26, %v546_v52  ;;  %v727_v55 = vadd.f32 %v1621_v26, %v566_v53 }
  0xfe   : > { %v766_v4 = vmax.f32 %v734_v62, 0.0  ;;  %v774_v5 = vmax.f32 %v742_v63, 0.0 }
  0xff   : > { %v751_v58 = vmax.f32 %v719_v54, 0.0  ;;  %v759_v59 = vmax.f32 %v727_v55, 0.0 }
 0x101   : > { %v1129_v60 = vpack.c.bf16 %v751_v58, %v750_v56  ;;  %v1149_v61 = vpack.c.bf16 %v759_v59, %v758_v57 }
 0x103   : > { %1193 = vst [vmem:[%s1631_s22 + $0x18] sm:$0xff] %v1129_v60   ;;  %v586_v0 = vpop.f32.mrf.mxu2  ;;  %v606_v1 = vpop.f32.mrf.mxu3 }
 0x104   : > { %1197 = vst [vmem:[%s1631_s22 + $0x38] sm:$0xff] %v1149_v61   ;;  %v735_v2 = vadd.f32 %v1621_v26, %v586_v0  ;;  %v743_v3 = vadd.f32 %v1621_v26, %v606_v1 }
 0x106   : > { %v767_v6 = vmax.f32 %v735_v2, 0.0  ;;  %v775_v7 = vmax.f32 %v743_v3, 0.0 }
 0x108   : > { %v1169_v8 = vpack.c.bf16 %v767_v6, %v766_v4  ;;  %v1189_v9 = vpack.c.bf16 %v775_v7, %v774_v5 }
 0x10a   : > { %1201 = vst [vmem:[%s1631_s22 + $0x58] sm:$0xff] %v1169_v8  }
 0x10b   : > { %1205 = vst [vmem:[%s1631_s22 + $0x78] sm:$0xff] %v1189_v9  }
 0x10c   : > { %1395 = shalt.err (!%p1392_p0)
}
 0x10d   : > { %s1459_s6 = smov 64   ;;  %s1460_s7 = smov 4  }
 0x10e   : > { %1236 = dma.vmem_to_hbm [thread:$0]  (%p1563_p5), %s855_s15, 2048, %s857_s19, %s841_s24, %s1459_s6, %s1459_s6, %s1460_s7  }
 0x10f PF: > { %s871_s1 = sand.u32 1, %s1434_s12   ;;  %p1247_p3 = pnand %p976_p11, %p1530_p6 }
 0x110   : > { %s872_s20 = scalar_lea.sflag [#allocation5], %s871_s1 }
 0x111   : > { %p1248_p7 = pneg %p1247_p3 }
 0x113   : > { %1429 = dma.done.wait (%p1248_p7), %s872_s20, 2048  }
 0x114   : > { %1431 = vsyncadd (%p1248_p7), %s872_s20, 4294965248  ;;  %s20_s17 = sadd.s32 1, %s1454_s17   ;;  %s1729_s12 = smov %s1438_s13 }
 0x115   : > { %p17_p9 = scmp.ge.s32.totalorder %s20_s17, 4   ;;  %s1730_s13 = smov %s1442_s14 }
 0x116   : > { %s1731_s14 = smov %s1572_s18  ;;  %s1732_s15 = smov %s1450_s16 }
 0x117   : > { %s1733_s16 = smov %s1735_s5  ;;  %19 = sbr.rel (!%p17_p9) target bundleno = 9 (0x9), region = 93 }
 0x11c   :  { %878 = vsyncpa [#allocation4], 1 }
 0x11d   :  { %880 = vsyncpa [#allocation4 + $0x1], 1 }
 0x11e   :  { %881 = vsyncpa [#allocation7], 1 }
 0x11f   :  { %882 = vsyncpa [#allocation5], 1 }
 0x120   :  { %884 = vsyncpa [#allocation5 + $0x1], 1 }

</bundles_post_ra>
